<compile_context>
chip_gen: v6e
topology: v6e:2x2x1
jax: 0.10.0
libtpu: 0.0.40
codegen_flags: <defaults>
</compile_context>

<pallas_src>
import jax
import jax.numpy as jnp
from jax.experimental import pallas as pl
from jax.experimental.pallas import tpu as pltpu


def _distort_rgb(r, g, b, order_fwd, apply_b, apply_c, apply_s, apply_h,
                 delta_b, alpha_c, alpha_s, delta_h):
    """Shared math for kernel and reference.  Shapes broadcast freely."""
    # --- RandomBrightness: add per-image delta, clip to [0, 1] (only if applied)
    r = jnp.where(apply_b, jnp.clip(r + delta_b, 0.0, 1.0), r)
    g = jnp.where(apply_b, jnp.clip(g + delta_b, 0.0, 1.0), g)
    b = jnp.where(apply_b, jnp.clip(b + delta_b, 0.0, 1.0), b)

    # --- RandomContrast applied BEFORE the HSV round-trip (backward ordering)
    pre = jnp.where(apply_c & jnp.logical_not(order_fwd),
                    alpha_c, jnp.ones_like(alpha_c))
    r, g, b = r * pre, g * pre, b * pre

    # --- RGB -> HSV (torchvision F._rgb2hsv)
    maxc = jnp.maximum(jnp.maximum(r, g), b)
    minc = jnp.minimum(jnp.minimum(r, g), b)
    eqc = maxc == minc
    cr = maxc - minc
    ones = jnp.ones_like(maxc)
    s = cr / jnp.where(eqc, ones, maxc)
    crd = jnp.where(eqc, ones, cr)
    rc = (maxc - r) / crd
    gc = (maxc - g) / crd
    bc = (maxc - b) / crd
    zeros = jnp.zeros_like(maxc)
    hr = jnp.where(maxc == r, bc - gc, zeros)
    hg = jnp.where((maxc == g) & (maxc != r), 2.0 + rc - bc, zeros)
    hb = jnp.where((maxc != g) & (maxc != r), 4.0 + gc - rc, zeros)
    h = jnp.mod((hr + hg + hb) / 6.0 + 1.0, 1.0)
    v = maxc

    # --- RandomSaturation (multiply S channel, no clip)
    s = s * jnp.where(apply_s, alpha_s, jnp.ones_like(alpha_s))
    # --- RandomHue (add to H channel, wrap to [0, 1))
    h = jnp.where(apply_h, jnp.mod(h + delta_h, 1.0), h)

    # --- HSV -> RGB (torchvision F._hsv2rgb)
    h6 = h * 6.0
    i_f = jnp.floor(h6)
    f = h6 - i_f
    i_f = jnp.where(i_f >= 6.0, i_f - 6.0, i_f)   # == i % 6 (handles h == 1.0)
    p = jnp.clip(v * (1.0 - s), 0.0, 1.0)
    q = jnp.clip(v * (1.0 - s * f), 0.0, 1.0)
    t = jnp.clip(v * (1.0 - s * (1.0 - f)), 0.0, 1.0)

    def pick(o0, o1, o2, o3, o4, o5):
        out = o5
        out = jnp.where(i_f == 4.0, o4, out)
        out = jnp.where(i_f == 3.0, o3, out)
        out = jnp.where(i_f == 2.0, o2, out)
        out = jnp.where(i_f == 1.0, o1, out)
        out = jnp.where(i_f == 0.0, o0, out)
        return out

    r2 = pick(v, q, p, p, t, v)
    g2 = pick(t, v, v, q, p, p)
    b2 = pick(p, p, t, v, v, q)

    # --- RandomContrast applied AFTER the HSV round-trip (forward ordering)
    post = jnp.where(apply_c & order_fwd, alpha_c, jnp.ones_like(alpha_c))
    return r2 * post, g2 * post, b2 * post


def _photometric_kernel(flags_ref, scal_ref, x_ref, o_ref):
    # flags_ref : SMEM int32[8]  -- [order_fwd, apply_b, apply_c, apply_s,
    #                               apply_h, perm0, perm1, perm2]
    # scal_ref  : SMEM f32[4, N] -- [delta_b; alpha_c; alpha_s; delta_h] per image
    # x_ref/o_ref : VMEM (1, 3, S_block, 128) lane-dense image tile
    n = pl.program_id(0)

    order_fwd = flags_ref[0] != 0
    apply_b = flags_ref[1] != 0
    apply_c = flags_ref[2] != 0
    apply_s = flags_ref[3] != 0
    apply_h = flags_ref[4] != 0
    p0 = flags_ref[5]
    p1 = flags_ref[6]
    p2 = flags_ref[7]

    delta_b = scal_ref[0, n]
    alpha_c = scal_ref[1, n]
    alpha_s = scal_ref[2, n]
    delta_h = scal_ref[3, n]

    r = x_ref[0, 0, :, :]
    g = x_ref[0, 1, :, :]
    b = x_ref[0, 2, :, :]

    r2, g2, b2 = _distort_rgb(r, g, b, order_fwd, apply_b, apply_c, apply_s,
                              apply_h, delta_b, alpha_c, alpha_s, delta_h)

    # --- RandomChannelSwap: out channel c = distorted channel perm[c]
    def pick_channel(idx):
        return jnp.where(idx == 0, r2, jnp.where(idx == 1, g2, b2))

    o_ref[0, 0, :, :] = pick_channel(p0)
    o_ref[0, 1, :, :] = pick_channel(p1)
    o_ref[0, 2, :, :] = pick_channel(p2)


def sample_photometric_params(key, n, *, brightness_delta=32.0 / 255.0,
                              hue_delta=18.0 / 255.0, contrast=(0.5, 1.5),
                              saturation=(0.5, 1.5), p=0.5):
    """Draw all random quantities of PhotometricDistort.forward (JAX RNG)."""
    keys = jax.random.split(key, 6)
    coins = jax.random.uniform(keys[0], (6,))
    order_fwd = coins[0] < 0.5          # torch.rand(1).item() < 0.5 in forward()
    apply_b = coins[1] < p
    apply_c = coins[2] < p
    apply_s = coins[3] < p
    apply_h = coins[4] < p
    apply_swap = coins[5] < p

    delta_b = jax.random.uniform(keys[1], (n,), minval=-brightness_delta,
                                 maxval=brightness_delta)
    alpha_c = jax.random.uniform(keys[2], (n,), minval=contrast[0],
                                 maxval=contrast[1])
    alpha_s = jax.random.uniform(keys[3], (n,), minval=saturation[0],
                                 maxval=saturation[1])
    delta_h = jax.random.uniform(keys[4], (n,), minval=-hue_delta,
                                 maxval=hue_delta)
    perm = jax.random.permutation(keys[5], 3)
    perm = jnp.where(apply_swap, perm, jnp.arange(3, dtype=perm.dtype))

    return dict(order_fwd=order_fwd, apply_b=apply_b, apply_c=apply_c,
                apply_s=apply_s, apply_h=apply_h, delta_b=delta_b,
                alpha_c=alpha_c, alpha_s=alpha_s, delta_h=delta_h, perm=perm)


def apply_photometric_distort(image, params, *, rows_per_block=1024):
    """Run the fused photometric-distort kernel on an (N, 3, H, W) image."""
    N, C, H, W = image.shape
    assert C == 3, "PhotometricDistort expects 3-channel RGB input."
    orig_dtype = image.dtype
    lanes = 128
    hw = H * W

    # Lane-dense layout: (N, 3, H, W) -> (N, 3, S, 128), padding HW up to 128.
    x = image.astype(jnp.float32).reshape(N, C, hw)
    pad = (-hw) % lanes
    if pad:
        x = jnp.pad(x, ((0, 0), (0, 0), (0, pad)))
    s_total = (hw + pad) // lanes
    x = x.reshape(N, C, s_total, lanes)

    # VMEM-budgeted spatial tiling (~1.5 MiB per block at 1024 rows).
    if s_total <= rows_per_block:
        s_block = s_total                       # full extent: no (8,128) constraint
    else:
        s_block = max(8, (rows_per_block // 8) * 8)
    n_row_tiles = pl.cdiv(s_total, s_block)

    flags = jnp.concatenate([
        jnp.stack([params["order_fwd"], params["apply_b"], params["apply_c"],
                   params["apply_s"], params["apply_h"]]).astype(jnp.int32),
        params["perm"].astype(jnp.int32),
    ])
    scal = jnp.stack([params["delta_b"], params["alpha_c"],
                      params["alpha_s"], params["delta_h"]]).astype(jnp.float32)

    out = pl.pallas_call(
        _photometric_kernel,
        out_shape=jax.ShapeDtypeStruct(x.shape, x.dtype),
        grid=(N, n_row_tiles),
        in_specs=[
            pl.BlockSpec(memory_space=pltpu.MemorySpace.SMEM),   # flags
            pl.BlockSpec(memory_space=pltpu.MemorySpace.SMEM),   # per-image scalars
            pl.BlockSpec((1, C, s_block, lanes), lambda n, t: (n, 0, t, 0)),
        ],
        out_specs=pl.BlockSpec((1, C, s_block, lanes), lambda n, t: (n, 0, t, 0)),
        input_output_aliases={2: 0},   # pure streaming update: reuse image buffer
        compiler_params=pltpu.CompilerParams(
            dimension_semantics=("parallel", "parallel"),
        ),
    )(flags, scal, x)

    out = out.reshape(N, C, hw + pad)[:, :, :hw].reshape(N, C, H, W)
    return out.astype(orig_dtype)


def photometric_distort(image, key):
    """End-to-end equivalent of PhotometricDistort.forward."""
    params = sample_photometric_params(key, image.shape[0])
    return apply_photometric_distort(image, params)


def _reference(image, params):
    """Pure-JAX reference using the same sampled parameters."""
    n = image.shape[0]
    per_img = lambda a: a.reshape(n, 1, 1)
    r, g, b = image[:, 0], image[:, 1], image[:, 2]
    r2, g2, b2 = _distort_rgb(
        r, g, b,
        params["order_fwd"], params["apply_b"], params["apply_c"],
        params["apply_s"], params["apply_h"],
        per_img(params["delta_b"]), per_img(params["alpha_c"]),
        per_img(params["alpha_s"]), per_img(params["delta_h"]))
    out = jnp.stack([r2, g2, b2], axis=1)
    return out[:, params["perm"], :, :]


if __name__ == "__main__":
    key = jax.random.PRNGKey(0)
    k_img, k_aug = jax.random.split(key)

    N, C, H, W = 2, 3, 16, 16
    image = jax.random.uniform(k_img, (N, C, H, W), dtype=jnp.float32)

    params = sample_photometric_params(k_aug, N)
    ref = jax.block_until_ready(_reference(image, params))

    out = apply_photometric_distort(image, params)
    out = jax.block_until_ready(out)

    assert out.shape == image.shape and out.dtype == image.dtype
    assert jnp.allclose(out, ref, atol=1e-5, rtol=1e-5), "mismatch vs reference"

    print("KERNEL_OK")
</pallas_src>

<mosaic_0001>
module attributes {stable_mosaic.version = 11 : i64} {
  func.func @_photometric_kernel(%arg0: i32, %arg1: i32, %arg2: memref<8xi32, #tpu.memory_space<smem>>, %arg3: memref<4x2xf32, #tpu.memory_space<smem>>, %arg4: memref<1x3x2x128xf32, #tpu.memory_space<vmem>>, %arg5: memref<1x3x2x128xf32, #tpu.memory_space<vmem>>) attributes {dimension_semantics = [#tpu.dimension_semantics<parallel>, #tpu.dimension_semantics<parallel>], iteration_bounds = array<i64: 2, 1>, scalar_prefetch = 0 : i64, scratch_operands = 0 : i64, tpu.core_type = #tpu.core_type<tc>, window_params = [{transform_indices = @transform_0, window_bounds = array<i64: 8>}, {transform_indices = @transform_1, window_bounds = array<i64: 4, 2>}, {transform_indices = @transform_2, window_bounds = array<i64: 1, 3, 2, 128>}, {transform_indices = @transform_3, window_bounds = array<i64: 1, 3, 2, 128>}]} {
    %c0 = arith.constant 0 : index
    %0 = memref.load %arg2[%c0] : memref<8xi32, #tpu.memory_space<smem>>
    %c0_i32 = arith.constant 0 : i32
    %1 = arith.cmpi ne, %0, %c0_i32 : i32
    %c1 = arith.constant 1 : index
    %2 = memref.load %arg2[%c1] : memref<8xi32, #tpu.memory_space<smem>>
    %c0_i32_0 = arith.constant 0 : i32
    %3 = arith.cmpi ne, %2, %c0_i32_0 : i32
    %c2 = arith.constant 2 : index
    %4 = memref.load %arg2[%c2] : memref<8xi32, #tpu.memory_space<smem>>
    %c0_i32_1 = arith.constant 0 : i32
    %5 = arith.cmpi ne, %4, %c0_i32_1 : i32
    %c3 = arith.constant 3 : index
    %6 = memref.load %arg2[%c3] : memref<8xi32, #tpu.memory_space<smem>>
    %c0_i32_2 = arith.constant 0 : i32
    %7 = arith.cmpi ne, %6, %c0_i32_2 : i32
    %c4 = arith.constant 4 : index
    %8 = memref.load %arg2[%c4] : memref<8xi32, #tpu.memory_space<smem>>
    %c0_i32_3 = arith.constant 0 : i32
    %9 = arith.cmpi ne, %8, %c0_i32_3 : i32
    %c5 = arith.constant 5 : index
    %10 = memref.load %arg2[%c5] : memref<8xi32, #tpu.memory_space<smem>>
    %c6 = arith.constant 6 : index
    %11 = memref.load %arg2[%c6] : memref<8xi32, #tpu.memory_space<smem>>
    %c7 = arith.constant 7 : index
    %12 = memref.load %arg2[%c7] : memref<8xi32, #tpu.memory_space<smem>>
    %c0_4 = arith.constant 0 : index
    %13 = arith.index_cast %arg0 : i32 to index
    %14 = memref.load %arg3[%c0_4, %13] : memref<4x2xf32, #tpu.memory_space<smem>>
    %c1_5 = arith.constant 1 : index
    %15 = arith.index_cast %arg0 : i32 to index
    %16 = memref.load %arg3[%c1_5, %15] : memref<4x2xf32, #tpu.memory_space<smem>>
    %c2_6 = arith.constant 2 : index
    %17 = arith.index_cast %arg0 : i32 to index
    %18 = memref.load %arg3[%c2_6, %17] : memref<4x2xf32, #tpu.memory_space<smem>>
    %c3_7 = arith.constant 3 : index
    %19 = arith.index_cast %arg0 : i32 to index
    %20 = memref.load %arg3[%c3_7, %19] : memref<4x2xf32, #tpu.memory_space<smem>>
    %c0_8 = arith.constant 0 : index
    %c0_9 = arith.constant 0 : index
    %c0_10 = arith.constant 0 : index
    %c0_11 = arith.constant 0 : index
    %21 = vector.load %arg4[%c0_8, %c0_9, %c0_10, %c0_11] : memref<1x3x2x128xf32, #tpu.memory_space<vmem>>, vector<1x1x2x128xf32>
    %22 = vector.shape_cast %21 : vector<1x1x2x128xf32> to vector<2x128xf32>
    %c0_12 = arith.constant 0 : index
    %c1_13 = arith.constant 1 : index
    %c0_14 = arith.constant 0 : index
    %c0_15 = arith.constant 0 : index
    %23 = vector.load %arg4[%c0_12, %c1_13, %c0_14, %c0_15] : memref<1x3x2x128xf32, #tpu.memory_space<vmem>>, vector<1x1x2x128xf32>
    %24 = vector.shape_cast %23 : vector<1x1x2x128xf32> to vector<2x128xf32>
    %c0_16 = arith.constant 0 : index
    %c2_17 = arith.constant 2 : index
    %c0_18 = arith.constant 0 : index
    %c0_19 = arith.constant 0 : index
    %25 = vector.load %arg4[%c0_16, %c2_17, %c0_18, %c0_19] : memref<1x3x2x128xf32, #tpu.memory_space<vmem>>, vector<1x1x2x128xf32>
    %26 = vector.shape_cast %25 : vector<1x1x2x128xf32> to vector<2x128xf32>
    %27 = vector.broadcast %14 : f32 to vector<2x128xf32>
    %28 = arith.addf %22, %27 : vector<2x128xf32>
    %cst = arith.constant 0.000000e+00 : f32
    %cst_20 = arith.constant 1.000000e+00 : f32
    %29 = vector.broadcast %cst : f32 to vector<2x128xf32>
    %30 = arith.maximumf %29, %28 : vector<2x128xf32>
    %31 = vector.broadcast %cst_20 : f32 to vector<2x128xf32>
    %32 = arith.minimumf %31, %30 : vector<2x128xf32>
    %33 = arith.select %3, %32, %22 : vector<2x128xf32>
    %34 = vector.broadcast %14 : f32 to vector<2x128xf32>
    %35 = arith.addf %24, %34 : vector<2x128xf32>
    %cst_21 = arith.constant 0.000000e+00 : f32
    %cst_22 = arith.constant 1.000000e+00 : f32
    %36 = vector.broadcast %cst_21 : f32 to vector<2x128xf32>
    %37 = arith.maximumf %36, %35 : vector<2x128xf32>
    %38 = vector.broadcast %cst_22 : f32 to vector<2x128xf32>
    %39 = arith.minimumf %38, %37 : vector<2x128xf32>
    %40 = arith.select %3, %39, %24 : vector<2x128xf32>
    %41 = vector.broadcast %14 : f32 to vector<2x128xf32>
    %42 = arith.addf %26, %41 : vector<2x128xf32>
    %cst_23 = arith.constant 0.000000e+00 : f32
    %cst_24 = arith.constant 1.000000e+00 : f32
    %43 = vector.broadcast %cst_23 : f32 to vector<2x128xf32>
    %44 = arith.maximumf %43, %42 : vector<2x128xf32>
    %45 = vector.broadcast %cst_24 : f32 to vector<2x128xf32>
    %46 = arith.minimumf %45, %44 : vector<2x128xf32>
    %47 = arith.select %3, %46, %26 : vector<2x128xf32>
    %true = arith.constant true
    %48 = arith.xori %1, %true : i1
    %49 = arith.andi %5, %48 : i1
    %cst_25 = arith.constant 1.000000e+00 : f32
    %50 = arith.select %49, %16, %cst_25 : f32
    %51 = vector.broadcast %50 : f32 to vector<2x128xf32>
    %52 = arith.mulf %33, %51 : vector<2x128xf32>
    %53 = vector.broadcast %50 : f32 to vector<2x128xf32>
    %54 = arith.mulf %40, %53 : vector<2x128xf32>
    %55 = vector.broadcast %50 : f32 to vector<2x128xf32>
    %56 = arith.mulf %47, %55 : vector<2x128xf32>
    %57 = arith.maximumf %52, %54 : vector<2x128xf32>
    %58 = arith.maximumf %57, %56 : vector<2x128xf32>
    %59 = arith.minimumf %52, %54 : vector<2x128xf32>
    %60 = arith.minimumf %59, %56 : vector<2x128xf32>
    %61 = arith.cmpf oeq, %58, %60 : vector<2x128xf32>
    %62 = arith.subf %58, %60 : vector<2x128xf32>
    %cst_26 = arith.constant 1.000000e+00 : f32
    %63 = vector.broadcast %cst_26 : f32 to vector<2x128xf32>
    %64 = arith.select %61, %63, %58 : vector<2x128xi1>, vector<2x128xf32>
    %65 = arith.divf %62, %64 : vector<2x128xf32>
    %66 = arith.select %61, %63, %62 : vector<2x128xi1>, vector<2x128xf32>
    %67 = arith.subf %58, %52 : vector<2x128xf32>
    %68 = arith.divf %67, %66 : vector<2x128xf32>
    %69 = arith.subf %58, %54 : vector<2x128xf32>
    %70 = arith.divf %69, %66 : vector<2x128xf32>
    %71 = arith.subf %58, %56 : vector<2x128xf32>
    %72 = arith.divf %71, %66 : vector<2x128xf32>
    %cst_27 = arith.constant 0.000000e+00 : f32
    %73 = vector.broadcast %cst_27 : f32 to vector<2x128xf32>
    %74 = arith.cmpf oeq, %58, %52 : vector<2x128xf32>
    %75 = arith.subf %72, %70 : vector<2x128xf32>
    %76 = arith.select %74, %75, %73 : vector<2x128xi1>, vector<2x128xf32>
    %77 = arith.cmpf oeq, %58, %54 : vector<2x128xf32>
    %78 = arith.cmpf one, %58, %52 : vector<2x128xf32>
    %79 = arith.andi %77, %78 : vector<2x128xi1>
    %cst_28 = arith.constant 2.000000e+00 : f32
    %80 = vector.broadcast %cst_28 : f32 to vector<2x128xf32>
    %81 = arith.addf %80, %68 : vector<2x128xf32>
    %82 = arith.subf %81, %72 : vector<2x128xf32>
    %83 = arith.select %79, %82, %73 : vector<2x128xi1>, vector<2x128xf32>
    %84 = arith.cmpf one, %58, %54 : vector<2x128xf32>
    %85 = arith.cmpf one, %58, %52 : vector<2x128xf32>
    %86 = arith.andi %84, %85 : vector<2x128xi1>
    %cst_29 = arith.constant 4.000000e+00 : f32
    %87 = vector.broadcast %cst_29 : f32 to vector<2x128xf32>
    %88 = arith.addf %87, %70 : vector<2x128xf32>
    %89 = arith.subf %88, %68 : vector<2x128xf32>
    %90 = arith.select %86, %89, %73 : vector<2x128xi1>, vector<2x128xf32>
    %91 = arith.addf %76, %83 : vector<2x128xf32>
    %92 = arith.addf %91, %90 : vector<2x128xf32>
    %cst_30 = arith.constant 6.000000e+00 : f32
    %93 = vector.broadcast %cst_30 : f32 to vector<2x128xf32>
    %94 = arith.divf %92, %93 : vector<2x128xf32>
    %cst_31 = arith.constant 1.000000e+00 : f32
    %95 = vector.broadcast %cst_31 : f32 to vector<2x128xf32>
    %96 = arith.addf %94, %95 : vector<2x128xf32>
    %cst_32 = arith.constant 1.000000e+00 : f32
    %97 = vector.broadcast %cst_32 : f32 to vector<2x128xf32>
    %98 = arith.remf %96, %97 : vector<2x128xf32>
    %cst_33 = arith.constant 0.000000e+00 : f32
    %99 = vector.broadcast %cst_33 : f32 to vector<2x128xf32>
    %100 = arith.cmpf one, %98, %99 : vector<2x128xf32>
    %cst_34 = arith.constant 0.000000e+00 : f32
    %101 = vector.broadcast %cst_34 : f32 to vector<2x128xf32>
    %102 = arith.cmpf olt, %98, %101 : vector<2x128xf32>
    %cst_35 = arith.constant 0.000000e+00 : f32
    %103 = arith.cmpf olt, %cst_32, %cst_35 : f32
    %104 = vector.broadcast %103 : i1 to vector<2x128xi1>
    %105 = vector.broadcast %104 : vector<2x128xi1> to vector<2x128xi1>
    %106 = arith.xori %102, %105 : vector<2x128xi1>
    %107 = arith.andi %106, %100 : vector<2x128xi1>
    %108 = vector.broadcast %cst_32 : f32 to vector<2x128xf32>
    %109 = arith.addf %98, %108 : vector<2x128xf32>
    %110 = arith.select %107, %109, %98 : vector<2x128xi1>, vector<2x128xf32>
    %cst_36 = arith.constant 1.000000e+00 : f32
    %111 = arith.select %7, %18, %cst_36 : f32
    %112 = vector.broadcast %111 : f32 to vector<2x128xf32>
    %113 = arith.mulf %65, %112 : vector<2x128xf32>
    %114 = vector.broadcast %20 : f32 to vector<2x128xf32>
    %115 = arith.addf %110, %114 : vector<2x128xf32>
    %cst_37 = arith.constant 1.000000e+00 : f32
    %116 = vector.broadcast %cst_37 : f32 to vector<2x128xf32>
    %117 = arith.remf %115, %116 : vector<2x128xf32>
    %cst_38 = arith.constant 0.000000e+00 : f32
    %118 = vector.broadcast %cst_38 : f32 to vector<2x128xf32>
    %119 = arith.cmpf one, %117, %118 : vector<2x128xf32>
    %cst_39 = arith.constant 0.000000e+00 : f32
    %120 = vector.broadcast %cst_39 : f32 to vector<2x128xf32>
    %121 = arith.cmpf olt, %117, %120 : vector<2x128xf32>
    %cst_40 = arith.constant 0.000000e+00 : f32
    %122 = arith.cmpf olt, %cst_37, %cst_40 : f32
    %123 = vector.broadcast %122 : i1 to vector<2x128xi1>
    %124 = vector.broadcast %123 : vector<2x128xi1> to vector<2x128xi1>
    %125 = arith.xori %121, %124 : vector<2x128xi1>
    %126 = arith.andi %125, %119 : vector<2x128xi1>
    %127 = vector.broadcast %cst_37 : f32 to vector<2x128xf32>
    %128 = arith.addf %117, %127 : vector<2x128xf32>
    %129 = arith.select %126, %128, %117 : vector<2x128xi1>, vector<2x128xf32>
    %130 = arith.select %9, %129, %110 : vector<2x128xf32>
    %cst_41 = arith.constant 6.000000e+00 : f32
    %131 = vector.broadcast %cst_41 : f32 to vector<2x128xf32>
    %132 = arith.mulf %130, %131 : vector<2x128xf32>
    %133 = math.floor %132 : vector<2x128xf32>
    %134 = arith.subf %132, %133 : vector<2x128xf32>
    %cst_42 = arith.constant 6.000000e+00 : f32
    %135 = vector.broadcast %cst_42 : f32 to vector<2x128xf32>
    %136 = arith.cmpf oge, %133, %135 : vector<2x128xf32>
    %cst_43 = arith.constant 6.000000e+00 : f32
    %137 = vector.broadcast %cst_43 : f32 to vector<2x128xf32>
    %138 = arith.subf %133, %137 : vector<2x128xf32>
    %139 = arith.select %136, %138, %133 : vector<2x128xi1>, vector<2x128xf32>
    %cst_44 = arith.constant 1.000000e+00 : f32
    %140 = vector.broadcast %cst_44 : f32 to vector<2x128xf32>
    %141 = arith.subf %140, %113 : vector<2x128xf32>
    %142 = arith.mulf %58, %141 : vector<2x128xf32>
    %cst_45 = arith.constant 0.000000e+00 : f32
    %cst_46 = arith.constant 1.000000e+00 : f32
    %143 = vector.broadcast %cst_45 : f32 to vector<2x128xf32>
    %144 = arith.maximumf %143, %142 : vector<2x128xf32>
    %145 = vector.broadcast %cst_46 : f32 to vector<2x128xf32>
    %146 = arith.minimumf %145, %144 : vector<2x128xf32>
    %147 = arith.mulf %113, %134 : vector<2x128xf32>
    %cst_47 = arith.constant 1.000000e+00 : f32
    %148 = vector.broadcast %cst_47 : f32 to vector<2x128xf32>
    %149 = arith.subf %148, %147 : vector<2x128xf32>
    %150 = arith.mulf %58, %149 : vector<2x128xf32>
    %cst_48 = arith.constant 0.000000e+00 : f32
    %cst_49 = arith.constant 1.000000e+00 : f32
    %151 = vector.broadcast %cst_48 : f32 to vector<2x128xf32>
    %152 = arith.maximumf %151, %150 : vector<2x128xf32>
    %153 = vector.broadcast %cst_49 : f32 to vector<2x128xf32>
    %154 = arith.minimumf %153, %152 : vector<2x128xf32>
    %cst_50 = arith.constant 1.000000e+00 : f32
    %155 = vector.broadcast %cst_50 : f32 to vector<2x128xf32>
    %156 = arith.subf %155, %134 : vector<2x128xf32>
    %157 = arith.mulf %113, %156 : vector<2x128xf32>
    %cst_51 = arith.constant 1.000000e+00 : f32
    %158 = vector.broadcast %cst_51 : f32 to vector<2x128xf32>
    %159 = arith.subf %158, %157 : vector<2x128xf32>
    %160 = arith.mulf %58, %159 : vector<2x128xf32>
    %cst_52 = arith.constant 0.000000e+00 : f32
    %cst_53 = arith.constant 1.000000e+00 : f32
    %161 = vector.broadcast %cst_52 : f32 to vector<2x128xf32>
    %162 = arith.maximumf %161, %160 : vector<2x128xf32>
    %163 = vector.broadcast %cst_53 : f32 to vector<2x128xf32>
    %164 = arith.minimumf %163, %162 : vector<2x128xf32>
    %cst_54 = arith.constant 4.000000e+00 : f32
    %165 = vector.broadcast %cst_54 : f32 to vector<2x128xf32>
    %166 = arith.cmpf oeq, %139, %165 : vector<2x128xf32>
    %167 = arith.select %166, %164, %58 : vector<2x128xi1>, vector<2x128xf32>
    %cst_55 = arith.constant 3.000000e+00 : f32
    %168 = vector.broadcast %cst_55 : f32 to vector<2x128xf32>
    %169 = arith.cmpf oeq, %139, %168 : vector<2x128xf32>
    %170 = arith.select %169, %146, %167 : vector<2x128xi1>, vector<2x128xf32>
    %cst_56 = arith.constant 2.000000e+00 : f32
    %171 = vector.broadcast %cst_56 : f32 to vector<2x128xf32>
    %172 = arith.cmpf oeq, %139, %171 : vector<2x128xf32>
    %173 = arith.select %172, %146, %170 : vector<2x128xi1>, vector<2x128xf32>
    %cst_57 = arith.constant 1.000000e+00 : f32
    %174 = vector.broadcast %cst_57 : f32 to vector<2x128xf32>
    %175 = arith.cmpf oeq, %139, %174 : vector<2x128xf32>
    %176 = arith.select %175, %154, %173 : vector<2x128xi1>, vector<2x128xf32>
    %cst_58 = arith.constant 0.000000e+00 : f32
    %177 = vector.broadcast %cst_58 : f32 to vector<2x128xf32>
    %178 = arith.cmpf oeq, %139, %177 : vector<2x128xf32>
    %179 = arith.select %178, %58, %176 : vector<2x128xi1>, vector<2x128xf32>
    %cst_59 = arith.constant 4.000000e+00 : f32
    %180 = vector.broadcast %cst_59 : f32 to vector<2x128xf32>
    %181 = arith.cmpf oeq, %139, %180 : vector<2x128xf32>
    %182 = arith.select %181, %146, %146 : vector<2x128xi1>, vector<2x128xf32>
    %cst_60 = arith.constant 3.000000e+00 : f32
    %183 = vector.broadcast %cst_60 : f32 to vector<2x128xf32>
    %184 = arith.cmpf oeq, %139, %183 : vector<2x128xf32>
    %185 = arith.select %184, %154, %182 : vector<2x128xi1>, vector<2x128xf32>
    %cst_61 = arith.constant 2.000000e+00 : f32
    %186 = vector.broadcast %cst_61 : f32 to vector<2x128xf32>
    %187 = arith.cmpf oeq, %139, %186 : vector<2x128xf32>
    %188 = arith.select %187, %58, %185 : vector<2x128xi1>, vector<2x128xf32>
    %cst_62 = arith.constant 1.000000e+00 : f32
    %189 = vector.broadcast %cst_62 : f32 to vector<2x128xf32>
    %190 = arith.cmpf oeq, %139, %189 : vector<2x128xf32>
    %191 = arith.select %190, %58, %188 : vector<2x128xi1>, vector<2x128xf32>
    %cst_63 = arith.constant 0.000000e+00 : f32
    %192 = vector.broadcast %cst_63 : f32 to vector<2x128xf32>
    %193 = arith.cmpf oeq, %139, %192 : vector<2x128xf32>
    %194 = arith.select %193, %164, %191 : vector<2x128xi1>, vector<2x128xf32>
    %cst_64 = arith.constant 4.000000e+00 : f32
    %195 = vector.broadcast %cst_64 : f32 to vector<2x128xf32>
    %196 = arith.cmpf oeq, %139, %195 : vector<2x128xf32>
    %197 = arith.select %196, %58, %154 : vector<2x128xi1>, vector<2x128xf32>
    %cst_65 = arith.constant 3.000000e+00 : f32
    %198 = vector.broadcast %cst_65 : f32 to vector<2x128xf32>
    %199 = arith.cmpf oeq, %139, %198 : vector<2x128xf32>
    %200 = arith.select %199, %58, %197 : vector<2x128xi1>, vector<2x128xf32>
    %cst_66 = arith.constant 2.000000e+00 : f32
    %201 = vector.broadcast %cst_66 : f32 to vector<2x128xf32>
    %202 = arith.cmpf oeq, %139, %201 : vector<2x128xf32>
    %203 = arith.select %202, %164, %200 : vector<2x128xi1>, vector<2x128xf32>
    %cst_67 = arith.constant 1.000000e+00 : f32
    %204 = vector.broadcast %cst_67 : f32 to vector<2x128xf32>
    %205 = arith.cmpf oeq, %139, %204 : vector<2x128xf32>
    %206 = arith.select %205, %146, %203 : vector<2x128xi1>, vector<2x128xf32>
    %cst_68 = arith.constant 0.000000e+00 : f32
    %207 = vector.broadcast %cst_68 : f32 to vector<2x128xf32>
    %208 = arith.cmpf oeq, %139, %207 : vector<2x128xf32>
    %209 = arith.select %208, %146, %206 : vector<2x128xi1>, vector<2x128xf32>
    %210 = arith.andi %5, %1 : i1
    %cst_69 = arith.constant 1.000000e+00 : f32
    %211 = arith.select %210, %16, %cst_69 : f32
    %212 = vector.broadcast %211 : f32 to vector<2x128xf32>
    %213 = arith.mulf %179, %212 : vector<2x128xf32>
    %214 = vector.broadcast %211 : f32 to vector<2x128xf32>
    %215 = arith.mulf %194, %214 : vector<2x128xf32>
    %216 = vector.broadcast %211 : f32 to vector<2x128xf32>
    %217 = arith.mulf %209, %216 : vector<2x128xf32>
    %c0_i32_70 = arith.constant 0 : i32
    %218 = arith.cmpi eq, %10, %c0_i32_70 : i32
    %c1_i32 = arith.constant 1 : i32
    %219 = arith.cmpi eq, %10, %c1_i32 : i32
    %220 = arith.select %219, %215, %217 : vector<2x128xf32>
    %221 = arith.select %218, %213, %220 : vector<2x128xf32>
    %c0_71 = arith.constant 0 : index
    %c0_72 = arith.constant 0 : index
    %c0_73 = arith.constant 0 : index
    %c0_74 = arith.constant 0 : index
    %222 = vector.load %arg5[%c0_71, %c0_72, %c0_73, %c0_74] : memref<1x3x2x128xf32, #tpu.memory_space<vmem>>, vector<1x1x2x128xf32>
    %223 = vector.shape_cast %222 : vector<1x1x2x128xf32> to vector<2x128xf32>
    %224 = vector.shape_cast %221 : vector<2x128xf32> to vector<1x1x2x128xf32>
    tpu.vector_store %arg5[%c0_71, %c0_72, %c0_73, %c0_74], %224 {strides = array<i32>} : memref<1x3x2x128xf32, #tpu.memory_space<vmem>>, vector<1x1x2x128xf32>,
    %c0_i32_75 = arith.constant 0 : i32
    %225 = arith.cmpi eq, %11, %c0_i32_75 : i32
    %c1_i32_76 = arith.constant 1 : i32
    %226 = arith.cmpi eq, %11, %c1_i32_76 : i32
    %227 = arith.select %226, %215, %217 : vector<2x128xf32>
    %228 = arith.select %225, %213, %227 : vector<2x128xf32>
    %c0_77 = arith.constant 0 : index
    %c1_78 = arith.constant 1 : index
    %c0_79 = arith.constant 0 : index
    %c0_80 = arith.constant 0 : index
    %229 = vector.load %arg5[%c0_77, %c1_78, %c0_79, %c0_80] : memref<1x3x2x128xf32, #tpu.memory_space<vmem>>, vector<1x1x2x128xf32>
    %230 = vector.shape_cast %229 : vector<1x1x2x128xf32> to vector<2x128xf32>
    %231 = vector.shape_cast %228 : vector<2x128xf32> to vector<1x1x2x128xf32>
    tpu.vector_store %arg5[%c0_77, %c1_78, %c0_79, %c0_80], %231 {strides = array<i32>} : memref<1x3x2x128xf32, #tpu.memory_space<vmem>>, vector<1x1x2x128xf32>,
    %c0_i32_81 = arith.constant 0 : i32
    %232 = arith.cmpi eq, %12, %c0_i32_81 : i32
    %c1_i32_82 = arith.constant 1 : i32
    %233 = arith.cmpi eq, %12, %c1_i32_82 : i32
    %234 = arith.select %233, %215, %217 : vector<2x128xf32>
    %235 = arith.select %232, %213, %234 : vector<2x128xf32>
    %c0_83 = arith.constant 0 : index
    %c2_84 = arith.constant 2 : index
    %c0_85 = arith.constant 0 : index
    %c0_86 = arith.constant 0 : index
    %236 = vector.load %arg5[%c0_83, %c2_84, %c0_85, %c0_86] : memref<1x3x2x128xf32, #tpu.memory_space<vmem>>, vector<1x1x2x128xf32>
    %237 = vector.shape_cast %236 : vector<1x1x2x128xf32> to vector<2x128xf32>
    %238 = vector.shape_cast %235 : vector<2x128xf32> to vector<1x1x2x128xf32>
    tpu.vector_store %arg5[%c0_83, %c2_84, %c0_85, %c0_86], %238 {strides = array<i32>} : memref<1x3x2x128xf32, #tpu.memory_space<vmem>>, vector<1x1x2x128xf32>,
    return
  }
  func.func @transform_0(%arg0: i32, %arg1: i32) -> i32 {
    %c0_i32 = arith.constant 0 : i32
    %c0_i32_0 = arith.constant 0 : i32
    return %c0_i32 : i32
  }
  func.func @transform_1(%arg0: i32, %arg1: i32) -> (i32, i32) {
    %c0_i32 = arith.constant 0 : i32
    %c0_i32_0 = arith.constant 0 : i32
    %c0_i32_1 = arith.constant 0 : i32
    return %c0_i32, %c0_i32_0 : i32, i32
  }
  func.func @transform_2(%arg0: i32, %arg1: i32) -> (i32, i32, i32, i32) {
    %c0_i32 = arith.constant 0 : i32
    %c0_i32_0 = arith.constant 0 : i32
    %c0_i32_1 = arith.constant 0 : i32
    return %arg0, %c0_i32, %arg1, %c0_i32_0 : i32, i32, i32, i32
  }
  func.func @transform_3(%arg0: i32, %arg1: i32) -> (i32, i32, i32, i32) {
    %c0_i32 = arith.constant 0 : i32
    %c0_i32_0 = arith.constant 0 : i32
    %c0_i32_1 = arith.constant 0 : i32
    return %arg0, %c0_i32, %arg1, %c0_i32_0 : i32, i32, i32, i32
  }
}

</mosaic_0001>

<bundles_post_ra>
// kernel: tpu_custom_call.1
= control target key start
LH: loop header
LB: loop body
LE: loop exit
PB: predicated region body
PF: predicated region fallthrough
CT: control target
= control target key end

     0   :  { %s1177_s0 = inlined_call_operand.vmem [shape: s32[8], index: 0, kind: input, shape index: {}]   ;;  %s1178_s1 = inlined_call_operand.vmem [shape: f32[4,2], index: 1, kind: input, shape index: {}]   ;;  %s1179_s2 = inlined_call_operand.hbm [shape: f32[2,3,2,128], index: 2, kind: input, shape index: {}, may-alias: {2,3}]   ;;  %s1180_s3 = inlined_call_operand.hbm [shape: f32[2,3,2,128], index: 3, kind: output, shape index: {}, may-alias: {2,3}]  }
   0x1   :  { %1187 = sst [smem:[#allocation14_spill]] %s1177_s0 }
   0x2   :  { %8 = vsyncpa [#allocation5], 0 }
   0x3   :  { %9 = vsyncpa [#allocation7], 0 }
   0x4   :  { %10 = vsyncpa [#allocation3], 0 }
   0x5   :  { %12 = vsyncpa [#allocation3 + $0x1], 0 }
   0x6   :  { %13 = vsyncpa [#allocation4], 0 }
   0x7   :  { %15 = vsyncpa [#allocation4 + $0x1], 0  ;;  %s878_s12 = smov 0   ;;  %s880_s13 = smov 0  }
   0x8   :  { %s882_s14 = smov 0   ;;  %s884_s15 = smov 0  }
   0x9   :  { %s886_s16 = smov 0   ;;  %s888_s17 = smov 0  }
   0xa LB: > { %s571_s18 = sadd.s32 4294967295, %s848_s17   ;;  %s572_s19 = sadd.s32 4294967294, %s848_s17   ;;  %s848_s17 = sphi %s888_s17, %s21_s17   ;;  %s844_s16 = sphi %s886_s16, %s1215_s16   ;;  %s840_s15 = sphi %s884_s15, %s1214_s15   ;;  %s836_s14 = sphi %s882_s14, %s1213_s14   ;;  %s832_s13 = sphi %s880_s13, %s1212_s13   ;;  %s828_s12 = sphi %s878_s12, %s1211_s12  }
   0xb   : > { %s84_s20 = sadd.s32 1, %s836_s14  ;;  %p91_p0 = scmp.ne.s32.totalorder %s836_s14, %s832_s13 }
   0xc   : > { %p92_p1 = scmp.eq.s32.totalorder %s848_s17, 0  ;;  %p97_p2 = scmp.ne.s32.totalorder %s832_s13, %s828_s12 }
   0xd   : > { %p916_p3 = scmp.eq.s32.totalorder %s571_s18, 0  ;;  %p123_p4 = scmp.eq.s32.totalorder %s571_s18, 1 }
   0xe   : > { %p920_p5 = por %p92_p1, %p91_p0  ;;  %p129_p6 = scmp.eq.s32.totalorder %s572_s19, 1 }
   0xf   : > { %s1188_s21 = scalar_select %p916_p3, 1, 0 }
  0x10   : > { %p926_p7 = por %p916_p3, %p97_p2  ;;  %p930_p8 = por %p123_p4, %p91_p0 }
  0x11   : > { %p934_p9 = por %p129_p6, %p97_p2  ;;  %p573_p10 = scmp.ge.s32.totalorder %s848_s17, 1 }
  0x12   : > { %s1190_s23 = scalar_select %p926_p7, 1, 0 }
  0x13   : > { %s1191_s24 = scalar_select %p930_p8, 1, 0 }
  0x14   : > { %s1192_s25 = scalar_select %p934_p9, 1, 0 }
  0x15   : > { %p136_p11 = scmp.lt.s32.totalorder %s848_s17, 3  ;;  %s1193_s0 = sld [smem:[#allocation14_spill]] }
  0x16   : > { %p640_p0 = scmp.lt.s32.totalorder %s848_s17, 2  ;;  %s160_s5 = sshll.u32 %s1178_s1, 4  ;;  %s161_s5 = int_to_ptr.vmem [resolvable:$true] %s160_s5 }
  0x17   : > { %p943_p12 = pnand %p573_p10, %p136_p11 }
  0x18   : > { %p956_p2 = pnand %p640_p0, %p920_p5 }
  0x19   : > { %s1194_s29 = scalar_select %p943_p12, 1, 0 }
  0x1a   : > { %p623_p1 = pneg %p943_p12 }
  0x1b   : > { %s149_s28 = sshll.u32 %s1193_s0, 4  ;;  %s150_s28 = int_to_ptr.vmem [resolvable:$true] %s149_s28 }
  0x1c   : > { %s1195_s6 = scalar_select %p956_p2, 1, 0 }
  0x1d   : > { %p962_p4 = pnand %p623_p1, %p916_p3  ;;  %s702_s8 = scalar_lea.vmem %s150_s28, 16 }
  0x1e   : > { %p703_p6 = scmp.ne.s32.totalorder %s150_s28, %s702_s8  ;;  %p710_p9 = scmp.lt.s32.totalorder %s150_s28, %s150_s28 }
  0x1f   : > { %p704_p10 = pneg %p962_p4  ;;  %p711_p8 = scmp.lt.s32.totalorder %s702_s8, %s702_s8 }
  0x21   : > { %p705_p11 = pnand %p704_p10, %p703_p6  ;;  %p712_p7 = por %p711_p8, %p710_p9 }
  0x23   : > { %p706_p13 = pneg %p705_p11 }
  0x25   : > { %p713_p5 = pnand %p712_p7, %p706_p13 }
  0x27   : > { %716 = shalt.err (!%p713_p5)
}
  0x28   : > { %s850_s9 = smov [#allocation2]   ;;  %s717_s10 = scalar_lea.vmem %s161_s5, 64 }
  0x29   : > { %626 = dma.vmem_to_smem (!%p962_p4), %s150_s28, 16, %s850_s9, [#allocation5]  }
  0x2a   : > { %p718_p0 = scmp.ne.s32.totalorder %s161_s5, %s717_s10  ;;  %p725_p12 = scmp.lt.s32.totalorder %s161_s5, %s161_s5 }
  0x2b   : > { %p726_p2 = scmp.lt.s32.totalorder %s717_s10, %s717_s10 }
  0x2c   : > { %p720_p1 = pnand %p718_p0, %p704_p10 }
  0x2d   : > { %p727_p6 = por %p726_p2, %p725_p12 }
  0x2e   : > { %p721_p3 = pneg %p720_p1 }
  0x30   : > { %p728_p11 = pnand %p727_p6, %p721_p3 }
  0x32   : > { %731 = shalt.err (!%p728_p11)
}
  0x33   : > { %s851_s11 = smov [#allocation6]   ;;  %s33_s18 = sadd.s32 1, %s844_s16 }
  0x34   : > { %629 = dma.vmem_to_smem (!%p962_p4), %s161_s5, 64, %s851_s11, [#allocation7]  }
  0x35   : > { %s171_s19 = sand.u32 1, %s836_s14   ;;  %p35_p7 = scmp.ge.s32.totalorder %s33_s18, 2 }
  0x36   : > { %s607_s22 = smul.u32 6, %s171_s19  ;;  %s172_s5 = scalar_lea.sflag [#allocation3], %s171_s19 }
  0x37   : > { %s1217_s18 = smov (%p35_p7, %s33_s18), 0  ;;  %s608_s26 = smul.u32 96, %s844_s16 }
  0x38   : > { %s79_s27 = ssub.s32 %s844_s16, %s1217_s18  ;;  %s175_s28 = scalar_lea.vmem [#allocation8], %s607_s22 }
  0x39   : > { %s183_s30 = sshll.u32 %s175_s28, 4  ;;  %p82_p3 = scmp.eq.s32.totalorder %s79_s27, 0  ;;  %s184_s30 = int_to_ptr.vmem [resolvable:$true] %s183_s30 }
  0x3a   : > { %s182_s8 = scalar_lea.hbm %s1179_s2, %s608_s26  ;;  %p1197_p8 = scmp.ne.s32.totalorder %s1195_s6, 0 }
  0x3b   : > { %s985_s9 = scalar_select %p82_p3, %s836_s14, %s84_s20  }
  0x3c   : > { %p734_p9 = pneg %p1197_p8  ;;  %s745_s10 = scalar_lea.vmem %s184_s30, 96 }
  0x3d   : > { %p746_p12 = scmp.ne.s32.totalorder %s184_s30, %s745_s10  ;;  %s852_s11 = smov [#allocation8]  }
  0x3e   : > { %s750_s0 = sshll.u32 %s852_s11, 4  ;;  %s751_s0 = int_to_ptr.vmem [resolvable:$false] %s750_s0 }
  0x3f   : > { %p748_p13 = pnand %p746_p12, %p734_p9  ;;  %s752_s22 = scalar_lea.vmem %s751_s0, 192 }
  0x40   : > { %p753_p4 = scmp.lt.s32.totalorder %s184_s30, %s751_s0  ;;  %p754_p10 = scmp.lt.s32.totalorder %s752_s22, %s745_s10 }
  0x41   : > { %p749_p2 = pneg %p748_p13 }
  0x42   : > { %p755_p5 = por %p754_p10, %p753_p4 }
  0x44   : > { %p756_p0 = pnand %p755_p5, %p749_p2 }
  0x46   : > { %759 = shalt.err (!%p756_p0)
}
  0x47   : > { %s853_s26 = smov 32   ;;  %s854_s20 = smov 2  }
  0x48   : > { %633 = dma.hbm_to_vmem [thread:$0]  (!%p1197_p8), %s182_s8, 96, %s184_s30, %s172_s5, %s853_s26, %s853_s26, %s854_s20  }
  0x49   : > { %p1198_p1 = scmp.ne.s32.totalorder %s1194_s29, 0 }
  0x4a   : > { %p1199_p6 = scmp.ne.s32.totalorder (!%p1198_p1), %s1188_s21, 0 }
  0x4b   : > { %195 = sbr.rel (%p1198_p1) target bundleno = 219 (0xdb), region = 32 }
  0x50   : > { %811 = dma.done.wait (%p1199_p6), [#allocation5], 16  }
  0x51   : > { %813 = vsyncadd (%p1199_p6), [#allocation5], 4294967280 }
  0x52   : > { %815 = dma.done.wait (%p1199_p6), [#allocation7], 64  }
  0x53   : > { %817 = vsyncadd (%p1199_p6), [#allocation7], 4294967232  ;;  %s1002_s0 = sand.u32 1, %s832_s13   ;;  %p1200_p11 = scmp.ne.s32.totalorder %s1190_s23, 0 }
  0x54   : > { %s609_s29 = smul.u32 6, %s1002_s0  ;;  %s206_s6 = scalar_lea.sflag [#allocation3], %s1002_s0 }
  0x56   : > { %s209_s19 = scalar_lea.vmem [#allocation8], %s609_s29 }
  0x57   : > { %819 = dma.done.wait (%p1200_p11), %s206_s6, 96  }
  0x58   : > { %821 = vsyncadd (%p1200_p11), %s206_s6, 4294967200 }
  0x59   : > { %214 = sfence }
  0x5a   : > { %s233_s27 = sld [smem:[#allocation2]]  ;;  %s247_s28 = sshra.s32 %s840_s15, 7  ;;  %v263_v0 = vld [vmem:[%s209_s19] sm:$0x3]  ;;  %v591_v1 = vld [vmem:[%s209_s19 + $0x2] sm:$0x3] }
  0x5b   : > { %s581_s21 = sld [smem:[#allocation2 + $0x1]]  ;;  %s1013_s4 = sshll.u32 %s247_s28, 7  ;;  %v592_v2 = vld [vmem:[%s209_s19 + $0x4] sm:$0x3] }
  0x5c   : > { %s582_s30 = sld [smem:[#allocation2 + $0x2]]  ;;  %s602_s7 = sadd.s32 128, %s1013_s4 }
  0x5d   : > { %s1017_s8 = sand.u32 127, %s840_s15  ;;  %s246_s23 = sld [smem:[#allocation6 + %s840_s15]] }
  0x5e   : > { %s253_s5 = sadd.s32 %s602_s7, %s1017_s8  ;;  %s604_s11 = sadd.s32 256, %s1013_s4 }
  0x5f   : > { %s1021_s10 = sld [smem:[#allocation6 + %s253_s5]]  ;;  %s1025_s22 = sadd.s32 %s604_s11, %s1017_s8 }
  0x60   : > { %p234_p7 = scmp.ne.s32.totalorder %s233_s27, 0  ;;  %p284_p9 = scmp.eq.s32.totalorder %s233_s27, 0 }
  0x61   : > { %p236_p8 = scmp.ne.s32.totalorder %s581_s21, 0  ;;  %s583_s27 = sld [smem:[#allocation2 + $0x3]] }
  0x62   : > { %p238_p3 = scmp.ne.s32.totalorder %s582_s30, 0  ;;  %s258_s21 = sld [smem:[#allocation6 + %s1025_s22]] }
  0x63   : > { %v268_v3 = vstv %s246_s23  ;;  %s272_s20 = scalar_select %p236_p8, 1, 0 }
  0x64   : > { %p1027_p12 = pnand %p238_p3, %p234_p7  ;;  %v269_v4 = vadd.f32 %v268_v3, %v263_v0  ;;  %v276_v5 = vadd.f32 %v591_v1, %v268_v3  ;;  %v280_v6 = vadd.f32 %v592_v2, %v268_v3  ;;  %p285_p13 = pnand %p284_p9, %p238_p3 }
  0x65   : > { %v273_v10 = vstv %s272_s20  ;;  %s606_s28 = sadd.s32 384, %s1013_s4  ;;  %s584_s5 = sld [smem:[#allocation2 + $0x4]] }
  0x66   : > { %v270_v7 = vmax.f32 %v269_v4, 0.0  ;;  %v277_v8 = vmax.f32 %v276_v5, 0.0  ;;  %v281_v9 = vmax.f32 %v280_v6, 0.0  ;;  %s593_s6 = scalar_select %p285_p13, 1.0, %s1021_s10  ;;  %vm274_vm0 = vcmp.eq.s32.totalorder %v273_v10, 1 }
  0x67   : > { %s595_s19 = scalar_select %p1027_p12, 1.0, %s1021_s10 }
  0x68   : > { %v271_v11 = vmin.f32 %v270_v7, 1.0  ;;  %v278_v12 = vmin.f32 %v277_v8, 1.0  ;;  %v282_v13 = vmin.f32 %v281_v9, 1.0  ;;  %v288_v14 = vstv %s593_s6  ;;  %p240_p2 = scmp.ne.s32.totalorder %s583_s27, 0  ;;  %s261_s30 = sadd.s32 %s606_s28, %s1017_s8 }
  0x69   : > { %s262_s7 = sld [smem:[#allocation6 + %s261_s30]]  ;;  %s232_s10 = scalar_lea.vmem [#allocation9], %s609_s29 }
  0x6a   : > { %v275_v15 = vsel %vm274_vm0, %v271_v11, %v263_v0  ;;  %v279_v16 = vsel %vm274_vm0, %v278_v12, %v591_v1  ;;  %v283_v17 = vsel %vm274_vm0, %v282_v13, %v592_v2  ;;  %s1219_s21 = smov (!%p240_p2, %s258_s21), 1.0  ;;  %s585_s8 = sld [smem:[#allocation2 + $0x5]] }
  0x6b   : > { %v289_v18 = vmul.f32 %v288_v14, %v275_v15  ;;  %v290_v19 = vmul.f32 %v288_v14, %v279_v16  ;;  %v291_v20 = vmul.f32 %v288_v14, %v283_v17  ;;  %v344_v32 = vstv %s1219_s21  ;;  %p242_p4 = scmp.ne.s32.totalorder %s584_s5, 0  ;;  %s1052_s23 = sld [smem:[#allocation2 + $0x6]] }
  0x6c   : > { %s1055_s11 = sld [smem:[#allocation2 + $0x7]]  ;;  %s464_s26 = sshll.u32 %s232_s10, 4  ;;  %s1118_s26 = int_to_ptr.vmem [resolvable:$true] %s464_s26 }
  0x6d   : > { %v292_v21 = vmax.f32 %v289_v18, %v290_v19  ;;  %v294_v22 = vmin.f32 %v289_v18, %v290_v19  ;;  %s363_s4 = scalar_select %p242_p4, 1, 0 }
  0x6e   : > { %s760_s5 = scalar_lea.vmem %s1118_s26, 96  ;;  %p1208_p3 = scmp.ne.s32.totalorder %s1191_s24, 0 }
  0x6f   : > { %v1035_v23 = vmax.f32 %v292_v21, %v291_v20  ;;  %v295_v24 = vmin.f32 %v294_v22, %v291_v20  ;;  %v346_v59 = vstv %s262_s7  ;;  %v364_v4 = vstv %s363_s4  ;;  %s450_s7 = scalar_lea.sflag [#allocation4], %s1002_s0  ;;  %p761_p7 = scmp.ne.s32.totalorder %s1118_s26, %s760_s5 }
  0x70   : > { %vm365_vm15 = vcmp.eq.s32.totalorder %v364_v4, 1  ;;  %p415_p10 = scmp.eq.s32.totalorder %s585_s8, 1  ;;  %p414_p5 = scmp.eq.s32.totalorder %s585_s8, 0 }
  0x71   : > { %vm296_vm1 = vcmp.eq.f32.partialorder %v1035_v23, %v295_v24  ;;  %v297_v25 = vsub.f32 %v1035_v23, %v295_v24  ;;  %v302_v28 = vsub.f32 %v1035_v23, %v289_v18  ;;  %v305_v29 = vsub.f32 %v1035_v23, %v290_v19  ;;  %p426_p0 = scmp.eq.s32.totalorder %s1052_s23, 1  ;;  %p425_p1 = scmp.eq.s32.totalorder %s1052_s23, 0 }
  0x72   : > { %v298_v26 = vsel %vm296_vm1, 1.0, %v1035_v23  ;;  %v307_v30 = vsub.f32 %v1035_v23, %v291_v20  ;;  %vm312_vm2 = vcmp.eq.f32.partialorder %v1035_v23, %v290_v19  ;;  %vm313_vm3 = vcmp.ne.f32.partialorder %v1035_v23, %v289_v18  ;;  %s416_s22 = scalar_select %p415_p10, 1, 0 }
  0x73   : > { %698 = vrcp.f32 %v298_v26  ;;  %v301_v27 = vsel %vm296_vm1, 1.0, %v297_v25  ;;  %vm318_vm4 = vcmp.ne.f32.partialorder %v1035_v23, %v290_v19  ;;  %vm309_vm5 = vcmp.eq.f32.partialorder %v1035_v23, %v289_v18  ;;  %vm314_vm6 = vmand %vm312_vm2, %vm313_vm3  ;;  %s1061_s20 = scalar_select %p414_p5, 1, 0 }
  0x74   : > { %700 = vrcp.f32 %v301_v27  ;;  %vm319_vm7 = vmand %vm318_vm4, %vm313_vm3  ;;  %p438_p6 = scmp.eq.s32.totalorder %s1055_s11, 1  ;;  %p437_p11 = scmp.eq.s32.totalorder %s1055_s11, 0  ;;  %v417_v27 = vstv %s416_s22 }
  0x75   : > { %s427_s6 = scalar_select %p426_p0, 1, 0 }
  0x76   : > { %s1068_s27 = scalar_select %p438_p6, 1, 0 }
  0x77   : > { %s1072_s21 = scalar_select %p425_p1, 1, 0 }
  0x78   : > { %s443_s28 = scalar_select %p437_p11, 1, 0 }
  0x79   : > { %p762_p8 = pnand %p761_p7, %p1208_p3  ;;  %s855_s4 = smov [#allocation9]  }
  0x7a   : > { %s764_s8 = sshll.u32 %s855_s4, 4  ;;  %s765_s8 = int_to_ptr.vmem [resolvable:$false] %s764_s8 }
  0x7b   : > { %p763_p9 = pneg %p762_p8  ;;  %s766_s23 = scalar_lea.vmem %s765_s8, 192 }
  0x7c   : > { %p767_p12 = scmp.lt.s32.totalorder %s1118_s26, %s765_s8  ;;  %p768_p13 = scmp.lt.s32.totalorder %s766_s23, %s760_s5 }
  0x7e   : > { %p769_p2 = por %p768_p13, %p767_p12 }
  0x80   : > { %v699_v31 = vpop.eup %698  ;;  %p770_p4 = pnand %p769_p2, %p763_p9 }
  0x81   : > { %v701_v33 = vpop.eup %700  ;;  %v300_v34 = vmul.f32 %v699_v31, %v297_v25  ;;  %v410_v31 = vstv %s595_s19  ;;  %s610_s19 = smul.u32 96, %s840_s15 }
  0x82   : > { %v304_v35 = vmul.f32 %v701_v33, %v302_v28  ;;  %v306_v36 = vmul.f32 %v701_v33, %v305_v29  ;;  %v308_v37 = vmul.f32 %v701_v33, %v307_v30  ;;  %v428_v30 = vstv %s427_s6 }
  0x83   : > { %v1048_v38 = vmul.f32 %v344_v32, %v300_v34  ;;  %v421_v33 = vstv %s1061_s20  ;;  %s1129_s30 = scalar_lea.hbm %s1180_s3, %s610_s19 }
  0x84   : > { %v310_v39 = vsub.f32 %v308_v37, %v306_v36  ;;  %v315_v40 = vadd.f32 2.0, %v304_v35  ;;  %v320_v41 = vadd.f32 4.0, %v306_v36 }
  0x85   : > { %v373_v10 = vsub.f32 1.0, %v1048_v38 }
  0x86   : > { %v311_v42 = vsel %vm309_vm5, %v310_v39, 0.0  ;;  %v316_v43 = vsub.f32 %v315_v40, %v308_v37  ;;  %v321_v44 = vsub.f32 %v320_v41, %v304_v35  ;;  %v440_v40 = vstv %s1068_s27 }
  0x87   : > { %v374_v13 = vmul.f32 %v373_v10, %v1035_v23 }
  0x88   : > { %v317_v45 = vsel %vm314_vm6, %v316_v43, 0.0  ;;  %v322_v46 = vsel %vm319_vm7, %v321_v44, 0.0  ;;  %vm1078_vm6 = vcmp.eq.s32.totalorder %v417_v27, 1  ;;  %v432_v44 = vstv %s1072_s21 }
  0x89   : > { %v323_v47 = vadd.f32 %v317_v45, %v311_v42  ;;  %v375_v17 = vmax.f32 %v374_v13, 0.0 }
  0x8b   : > { %v324_v48 = vadd.f32 %v323_v47, %v322_v46  ;;  %v376_v24 = vmin.f32 %v375_v17, 1.0 }
  0x8d   : > { %v326_v49 = vmul.f32 0.16666667, %v324_v48  ;;  %v444_v48 = vstv %s443_s28 }
  0x8f   : > { %v327_v50 = vadd.f32 1.0, %v326_v49 }
  0x91   : > { %v328_v51 = vand.u32 2147483647, %v327_v50  ;;  %v336_v54 = vand.u32 2147483648, %v327_v50 }
  0x93   : > { %v331_v52 = vfloor.f32 %v328_v51 }
  0x95   : > { %v332_v53 = vsub.f32 %v328_v51, %v331_v52 }
  0x97   : > { %vm333_vm8 = vcmp.eq.f32.partialorder %v332_v53, 1.0 }
  0x98   : > { %v334_v55 = vsel %vm333_vm8, 0.0, %v332_v53  ;;  %vm1092_vm8 = vcmp.eq.s32.totalorder %v428_v30, 1 }
  0x99   : > { %v335_v56 = vand.u32 2147483647, %v334_v55 }
  0x9b   : > { %v337_v57 = vor.u32 %v336_v54, %v335_v56 }
  0x9d   : > { %vm338_vm9 = vcmp.ne.f32.partialorder %v337_v57, 0.0  ;;  %vm339_vm10 = vcmp.lt.f32.partialorder %v337_v57, 0.0  ;;  %v341_v58 = vadd.f32 1.0, %v337_v57 }
  0x9e   : > { %vm340_vm11 = vmand %vm339_vm10, %vm338_vm9  ;;  %vm1110_vm9 = vcmp.eq.s32.totalorder %v440_v40, 1  ;;  %vm422_vm10 = vcmp.eq.s32.totalorder %v421_v33, 1 }
  0x9f   : > { %v342_v60 = vsel %vm340_vm11, %v341_v58, %v337_v57  ;;  %vm433_vm11 = vcmp.eq.s32.totalorder %v432_v44, 1 }
  0xa0   : > { %v347_v61 = vadd.f32 %v346_v59, %v342_v60 }
  0xa2   : > { %v348_v62 = vand.u32 2147483647, %v347_v61  ;;  %v356_v1 = vand.u32 2147483648, %v347_v61 }
  0xa4   : > { %v351_v63 = vfloor.f32 %v348_v62 }
  0xa6   : > { %v352_v0 = vsub.f32 %v348_v62, %v351_v63 }
  0xa8   : > { %vm353_vm12 = vcmp.eq.f32.partialorder %v352_v0, 1.0 }
  0xa9   : > { %v354_v2 = vsel %vm353_vm12, 0.0, %v352_v0  ;;  %vm445_vm12 = vcmp.eq.s32.totalorder %v444_v48, 1 }
  0xaa   : > { %v355_v3 = vand.u32 2147483647, %v354_v2 }
  0xac   : > { %v357_v5 = vor.u32 %v356_v1, %v355_v3 }
  0xae   : > { %vm358_vm13 = vcmp.ne.f32.partialorder %v357_v5, 0.0  ;;  %vm359_vm14 = vcmp.lt.f32.partialorder %v357_v5, 0.0  ;;  %v361_v6 = vadd.f32 1.0, %v357_v5 }
  0xaf   : > { %vm360_vm0 = vmand %vm359_vm14, %vm358_vm13 }
  0xb0   : > { %v362_v7 = vsel %vm360_vm0, %v361_v6, %v357_v5 }
  0xb1   : > { %v366_v8 = vsel %vm365_vm15, %v362_v7, %v342_v60 }
  0xb2   : > { %v367_v9 = vmul.f32 6.0, %v366_v8 }
  0xb4   : > { %v368_v11 = vfloor.f32 %v367_v9 }
  0xb6   : > { %v369_v12 = vsub.f32 %v367_v9, %v368_v11  ;;  %v594_v14 = vadd.f32 -6.0, %v368_v11  ;;  %vm370_vm1 = vcmp.ge.f32.partialorder %v368_v11, 6.0 }
  0xb8   : > { %v377_v15 = vmul.f32 %v369_v12, %v1048_v38  ;;  %v382_v16 = vsub.f32 1.0, %v369_v12  ;;  %v372_v20 = vsel %vm370_vm1, %v594_v14, %v368_v11 }
  0xb9   : > { %vm388_vm2 = vcmp.eq.f32.partialorder %v372_v20, 4.0  ;;  %vm390_vm3 = vcmp.eq.f32.partialorder %v372_v20, 3.0  ;;  %vm392_vm4 = vcmp.eq.f32.partialorder %v372_v20, 2.0  ;;  %vm394_vm5 = vcmp.eq.f32.partialorder %v372_v20, 1.0 }
  0xba   : > { %v378_v18 = vsub.f32 1.0, %v377_v15  ;;  %v383_v19 = vmul.f32 %v382_v16, %v1048_v38  ;;  %vm396_vm7 = vcmp.eq.f32.partialorder %v372_v20, 0.0 }
  0xbc   : > { %v379_v21 = vmul.f32 %v378_v18, %v1035_v23  ;;  %v384_v22 = vsub.f32 1.0, %v383_v19 }
  0xbe   : > { %v380_v25 = vmax.f32 %v379_v21, 0.0  ;;  %v385_v26 = vmul.f32 %v384_v22, %v1035_v23 }
  0xc0   : > { %v381_v28 = vmin.f32 %v380_v25, 1.0  ;;  %v386_v29 = vmax.f32 %v385_v26, 0.0 }
  0xc2   : > { %v387_v34 = vmin.f32 %v386_v29, 1.0  ;;  %v398_v35 = vsel %vm390_vm3, %v381_v28, %v376_v24  ;;  %v402_v36 = vsel %vm388_vm2, %v1035_v23, %v381_v28 }
  0xc3   : > { %v399_v37 = vsel %vm392_vm4, %v1035_v23, %v398_v35  ;;  %v403_v38 = vsel %vm390_vm3, %v1035_v23, %v402_v36 }
  0xc4   : > { %v389_v41 = vsel %vm388_vm2, %v387_v34, %v1035_v23  ;;  %v400_v42 = vsel %vm394_vm5, %v1035_v23, %v399_v37  ;;  %v404_v43 = vsel %vm392_vm4, %v387_v34, %v403_v38 }
  0xc5   : > { %v391_v45 = vsel %vm390_vm3, %v376_v24, %v389_v41  ;;  %v401_v46 = vsel %vm396_vm7, %v387_v34, %v400_v42  ;;  %v405_v47 = vsel %vm394_vm5, %v376_v24, %v404_v43 }
  0xc6   : > { %v393_v49 = vsel %vm392_vm4, %v376_v24, %v391_v45  ;;  %v406_v50 = vsel %vm396_vm7, %v376_v24, %v405_v47  ;;  %v412_v51 = vmul.f32 %v410_v31, %v401_v46 }
  0xc7   : > { %v395_v53 = vsel %vm394_vm5, %v381_v28, %v393_v49  ;;  %v413_v54 = vmul.f32 %v410_v31, %v406_v50 }
  0xc8   : > { %v397_v55 = vsel %vm396_vm7, %v1035_v23, %v395_v53 }
  0xc9   : > { %v411_v56 = vmul.f32 %v410_v31, %v397_v55  ;;  %v419_v57 = vsel %vm1078_vm6, %v412_v51, %v413_v54  ;;  %v430_v58 = vsel %vm1092_vm8, %v412_v51, %v413_v54  ;;  %v442_v59 = vsel %vm1110_vm9, %v412_v51, %v413_v54 }
  0xcb   : > { %v423_v23 = vsel %vm422_vm10, %v411_v56, %v419_v57  ;;  %v434_v60 = vsel %vm433_vm11, %v411_v56, %v430_v58  ;;  %v446_v61 = vsel %vm445_vm12, %v411_v56, %v442_v59 }
  0xcc   : > { %424 = vst [vmem:[%s232_s10] sm:$0x3] %v423_v23  ;;  %596 = vst [vmem:[%s232_s10 + $0x2] sm:$0x3] %v434_v60 }
  0xcd   : > { %597 = vst [vmem:[%s232_s10 + $0x4] sm:$0x3] %v446_v61 }
  0xce   : > { %773 = shalt.err (!%p770_p4)
}
  0xcf   : > { %s774_s11 = scalar_lea.hbm %s1129_s30, 96  ;;  %s778_s6 = scalar_lea.hbm %s1180_s3, 192 }
  0xd0   : > { %p775_p10 = scmp.ne.s32.totalorder %s1129_s30, %s774_s11  ;;  %p779_p1 = scmp.lt.s32.totalorder %s1129_s30, %s1180_s3 }
  0xd1   : > { %p780_p6 = scmp.lt.s32.totalorder %s778_s6, %s774_s11 }
  0xd2   : > { %p776_p5 = pnand %p775_p10, %p1208_p3 }
  0xd3   : > { %p781_p11 = por %p780_p6, %p779_p1 }
  0xd4   : > { %p777_p0 = pneg %p776_p5 }
  0xd6   : > { %p782_p7 = pnand %p781_p11, %p777_p0 }
  0xd8   : > { %785 = shalt.err (!%p782_p7)
}
  0xd9   : > { %s856_s28 = smov 32   ;;  %s857_s10 = smov 2  }
  0xda   : > { %621 = dma.vmem_to_hbm [thread:$0]  (%p1208_p3), %s1118_s26, 96, %s1129_s30, %s450_s7, %s856_s28, %s856_s28, %s857_s10  }
  0xdb PF: > { %s479_s19 = sand.u32 1, %s828_s12   ;;  %p1209_p8 = scmp.ne.s32.totalorder %s1192_s25, 0 }
  0xdc   : > { %p1210_p9 = scmp.ge.s32.totalorder %s848_s17, 2  ;;  %s480_s15 = scalar_lea.sflag [#allocation4], %s479_s19 }
  0xde   : > { %p635_p12 = pnand %p1210_p9, %p1209_p8 }
  0xe0   : > { %p636_p13 = pneg %p635_p12 }
  0xe2   : > { %823 = dma.done.wait (%p636_p13), %s480_s15, 96  }
  0xe3   : > { %825 = vsyncadd (%p636_p13), %s480_s15, 4294967200  ;;  %s21_s17 = sadd.s32 1, %s848_s17   ;;  %s1211_s12 = smov %s832_s13 }
  0xe4   : > { %p18_p2 = scmp.ge.s32.totalorder %s21_s17, 4   ;;  %s1212_s13 = smov %s836_s14 }
  0xe5   : > { %s1213_s14 = smov %s985_s9  ;;  %s1214_s15 = smov %s844_s16 }
  0xe6   : > { %s1215_s16 = smov %s1217_s18  ;;  %20 = sbr.rel (!%p18_p2) target bundleno = 10 (0xa), region = 90 }
  0xeb   :  { %485 = vsyncpa [#allocation3], 1 }
  0xec   :  { %487 = vsyncpa [#allocation3 + $0x1], 1 }
  0xed   :  { %488 = vsyncpa [#allocation4], 1 }
  0xee   :  { %490 = vsyncpa [#allocation4 + $0x1], 1 }
  0xef   :  { %491 = vsyncpa [#allocation5], 1 }
  0xf0   :  { %493 = vsyncpa [#allocation5 + $0x1], 1 }
  0xf1   :  { %494 = vsyncpa [#allocation7], 1 }

</bundles_post_ra>
